<compile_context>
chip_gen: v6e
topology: v6e:2x2x1
jax: 0.10.0
libtpu: 0.0.40
codegen_flags: <defaults>
</compile_context>

<pallas_src>
import functools

import numpy as np
import jax
import jax.numpy as jnp
from jax.experimental import pallas as pl
from jax.experimental.pallas import tpu as pltpu

# ----------------------------- static network config -----------------------------

C_IN, H0, W0 = 4, 16, 16
C_MID = 8
C_OUT = 16
H1, W1 = H0 // 2, W0 // 2
N0 = H0 * W0                 # 256 flat pixels seen by conv0
N1 = H1 * W1                 # 64  flat pixels seen by conv2
OFF0 = 128                   # lane-aligned placement of the image in the padded scratch
OFF1 = 128
PADLEN0 = OFF0 + N0 + 128    # 512  (pad >= max |tap shift| = W0+1 = 17 on each side)
PADLEN1 = OFF1 + N1 + 128    # 320  (pad >= max |tap shift| = W1+1 = 9  on each side)
LRELU_SLOPE = 0.01           # nn.LeakyReLU() default negative_slope
TAPS = tuple((di, dj) for di in (-1, 0, 1) for dj in (-1, 0, 1))

INPUT_DIMENSIONS = (C_IN, H0, W0)   # mirrors self.input_dimensions
INPUT_SIZE = functools.reduce(lambda a, b: a * b, INPUT_DIMENSIONS, 1)


# --------------------------------- Pallas kernel ----------------------------------

def _conv3x3_same_flat(xz_ref, off, width, n, w_taps_ref, b_ref):
    """3x3 'same' (pad=1, stride=1) conv on a zero-padded flat activation.

    xz_ref     : (Cin, padlen) VMEM scratch; the activation occupies lanes
                 [off, off+n) (flat index m = y*width + x), zeros elsewhere.
    w_taps_ref : (9, Cout, Cin) weights, tap-major: tap t = (di+1)*3 + (dj+1).
    b_ref      : (Cout, 1) bias.
    Returns (Cout, n) f32 pre-activation.
    """
    col = jax.lax.broadcasted_iota(jnp.int32, (1, n), 1) % width
    keep_left = col != 0              # tap dj=-1 needs source x-1 >= 0
    keep_right = col != (width - 1)   # tap dj=+1 needs source x+1 <  width

    acc = None
    for t, (di, dj) in enumerate(TAPS):
        s = di * width + dj
        tap = xz_ref[:, off + s: off + s + n]          # (Cin, n) shifted view, zero halo
        if dj == -1:
            tap = jnp.where(keep_left, tap, 0.0)
        elif dj == 1:
            tap = jnp.where(keep_right, tap, 0.0)
        part = jnp.dot(w_taps_ref[t], tap, preferred_element_type=jnp.float32)
        acc = part if acc is None else acc + part
    return acc + b_ref[...]


def _fused_cnn_kernel(x_ref, w0_ref, b0_ref, pm_ref, w2_ref, b2_ref, o_ref,
                      xz0_ref, xz1_ref):
    # Stage this image into a zero-padded flat VMEM scratch (in-kernel "padding=1").
    xz0_ref[...] = jnp.zeros_like(xz0_ref)
    xz0_ref[:, OFF0:OFF0 + N0] = x_ref[0]              # (4, 256), lane-aligned store

    # conv0 (4->8, 3x3, pad 1) + LeakyReLU; output lane axis = 256 pixels.
    a0 = _conv3x3_same_flat(xz0_ref, OFF0, W0, N0, w0_ref, b0_ref)
    a0 = jnp.where(a0 >= 0.0, a0, LRELU_SLOPE * a0)

    # 2x2 / stride-2 average pool as a GEMM with a constant 0.25 pooling matrix.
    pooled = jnp.dot(a0, pm_ref[...], preferred_element_type=jnp.float32)   # (8, 64)

    # Stage pooled activation for conv2's in-kernel padding.
    xz1_ref[...] = jnp.zeros_like(xz1_ref)
    xz1_ref[:, OFF1:OFF1 + N1] = pooled

    # conv2 (8->16, 3x3, pad 1) + LeakyReLU.
    a2 = _conv3x3_same_flat(xz1_ref, OFF1, W1, N1, w2_ref, b2_ref)
    a2 = jnp.where(a2 >= 0.0, a2, LRELU_SLOPE * a2)

    # Dropout(p=0) layers are the identity.
    o_ref[0] = a2                                      # (16, 64) lane-dense store


# --------------------------------- JAX wrapper -------------------------------------

def _pool_matrix():
    pm = np.zeros((N0, N1), np.float32)
    for y in range(H0):
        for x in range(W0):
            pm[y * W0 + x, (y // 2) * W1 + (x // 2)] = 0.25
    return pm


_POOL_MATRIX = _pool_matrix()


@jax.jit
def convolutional_kernel_forward(params, x):
    # forward(): input.view(-1, *self.input_dimensions)
    x = x.reshape(-1, *INPUT_DIMENSIONS).astype(jnp.float32)
    b = x.shape[0]
    xflat = x.reshape(b, C_IN, N0)                     # contiguous reshape, no copy

    # Tap-major weight layout: w_taps[t, o, c] = w[o, c, di+1, dj+1], t=(di+1)*3+(dj+1).
    w0t = jnp.transpose(params["w0"], (2, 3, 0, 1)).reshape(9, C_MID, C_IN)
    w2t = jnp.transpose(params["w2"], (2, 3, 0, 1)).reshape(9, C_OUT, C_MID)
    b0 = params["b0"].reshape(C_MID, 1)
    b2 = params["b2"].reshape(C_OUT, 1)
    pm = jnp.asarray(_POOL_MATRIX)

    out = pl.pallas_call(
        _fused_cnn_kernel,
        out_shape=jax.ShapeDtypeStruct((b, C_OUT, N1), jnp.float32),
        grid=(b,),
        in_specs=[
            pl.BlockSpec((1, C_IN, N0), lambda i: (i, 0, 0)),       # image (streams)
            pl.BlockSpec((9, C_MID, C_IN), lambda i: (0, 0, 0)),    # conv0 weights (resident)
            pl.BlockSpec((C_MID, 1), lambda i: (0, 0)),             # conv0 bias
            pl.BlockSpec((N0, N1), lambda i: (0, 0)),               # pooling matrix
            pl.BlockSpec((9, C_OUT, C_MID), lambda i: (0, 0, 0)),   # conv2 weights
            pl.BlockSpec((C_OUT, 1), lambda i: (0, 0)),             # conv2 bias
        ],
        out_specs=pl.BlockSpec((1, C_OUT, N1), lambda i: (i, 0, 0)),
        scratch_shapes=[
            pltpu.VMEM((C_IN, PADLEN0), jnp.float32),               # padded conv0 input
            pltpu.VMEM((C_MID, PADLEN1), jnp.float32),              # padded conv2 input
        ],
        compiler_params=pltpu.CompilerParams(
            dimension_semantics=("parallel",),                      # v7x: 2 TCs split batch
        ),
    )(xflat, w0t, b0, pm, w2t, b2)

    # (B, 16, 64) -> NCHW (B, 16, 8, 8): trailing-dim reshape, no data movement.
    return out.reshape(b, C_OUT, H1, W1)


# ----------------------------- parameter construction -------------------------------

def _kaiming_normal(key, shape):
    # nn.init.kaiming_normal_ default: fan_in mode, gain = sqrt(2)
    fan_in = shape[1] * shape[2] * shape[3]
    std = (2.0 / fan_in) ** 0.5
    return std * jax.random.normal(key, shape, dtype=jnp.float32)


def _conv_bias(key, cout, fan_in):
    bound = 1.0 / (fan_in ** 0.5)
    return jax.random.uniform(key, (cout,), jnp.float32, -bound, bound)


def make_params(seed=0):
    k = jax.random.PRNGKey(seed)
    k1, k2, k3, k4 = jax.random.split(k, 4)
    return {
        # conv0: Conv2d(4 -> 8, k=3, stride=1, pad=1)
        "w0": _kaiming_normal(k1, (C_MID, C_IN, 3, 3)),
        "b0": _conv_bias(k2, C_MID, C_IN * 3 * 3),
        # conv2: Conv2d(8 -> 16, k=3, stride=1, pad=1)
        "w2": _kaiming_normal(k3, (C_OUT, C_MID, 3, 3)),
        "b2": _conv_bias(k4, C_OUT, C_MID * 3 * 3),
    }


# ----------------------------------- reference --------------------------------------

def _reference_forward(params, x):
    """Pure-JAX (XLA) reference to validate the fused Pallas path."""
    x = x.reshape(-1, *INPUT_DIMENSIONS).astype(jnp.float32)

    def conv(x, w, b):
        y = jax.lax.conv_general_dilated(
            x, w, window_strides=(1, 1), padding=((1, 1), (1, 1)),
            dimension_numbers=("NCHW", "OIHW", "NCHW"))
        y = y + b.reshape(1, -1, 1, 1)
        return jnp.where(y >= 0, y, LRELU_SLOPE * y)

    x = conv(x, params["w0"], params["b0"])
    bb, c, h, w = x.shape
    x = x.reshape(bb, c, h // 2, 2, w // 2, 2).mean(axis=(3, 5))
    x = conv(x, params["w2"], params["b2"])
    return x


# ------------------------------------- main ------------------------------------------

if __name__ == "__main__":
    key = jax.random.PRNGKey(0)
    x = jax.random.normal(key, (2, 4, 16, 16), dtype=jnp.float32)

    params = make_params(seed=0)

    out = convolutional_kernel_forward(params, x)
    out = jax.block_until_ready(out)

    assert out.shape == (2, 16, 8, 8), out.shape
    # mirrors: assert not torch.isnan(output).any()
    assert not bool(jnp.isnan(out).any())

    ref = _reference_forward(params, x)
    assert bool(jnp.allclose(out, ref, rtol=1e-4, atol=1e-4)), (
        float(jnp.max(jnp.abs(out - ref))))

    print("KERNEL_OK")
</pallas_src>

<mosaic_0001>
module attributes {stable_mosaic.version = 11 : i64} {
  func.func @_fused_cnn_kernel(%arg0: i32, %arg1: memref<1x4x256xf32, #tpu.memory_space<vmem>>, %arg2: memref<9x8x4xf32, #tpu.memory_space<vmem>>, %arg3: memref<8x1xf32, #tpu.memory_space<vmem>>, %arg4: memref<256x64xf32, #tpu.memory_space<vmem>>, %arg5: memref<9x16x8xf32, #tpu.memory_space<vmem>>, %arg6: memref<16x1xf32, #tpu.memory_space<vmem>>, %arg7: memref<1x16x64xf32, #tpu.memory_space<vmem>>, %arg8: memref<4x512xf32, #tpu.memory_space<vmem>>, %arg9: memref<8x320xf32, #tpu.memory_space<vmem>>) attributes {dimension_semantics = [#tpu.dimension_semantics<parallel>], iteration_bounds = array<i64: 2>, scalar_prefetch = 0 : i64, scratch_operands = 2 : i64, tpu.core_type = #tpu.core_type<tc>, window_params = [{transform_indices = @transform_0, window_bounds = array<i64: 1, 4, 256>}, {pipeline_mode = #tpu.pipeline_mode<synchronous>, transform_indices = @transform_1, window_bounds = array<i64: 9, 8, 4>}, {pipeline_mode = #tpu.pipeline_mode<synchronous>, transform_indices = @transform_2, window_bounds = array<i64: 8, 1>}, {pipeline_mode = #tpu.pipeline_mode<synchronous>, transform_indices = @transform_3, window_bounds = array<i64: 256, 64>}, {pipeline_mode = #tpu.pipeline_mode<synchronous>, transform_indices = @transform_4, window_bounds = array<i64: 9, 16, 8>}, {pipeline_mode = #tpu.pipeline_mode<synchronous>, transform_indices = @transform_5, window_bounds = array<i64: 16, 1>}, {transform_indices = @transform_6, window_bounds = array<i64: 1, 16, 64>}]} {
    %cst = arith.constant 0.000000e+00 : f32
    %0 = vector.broadcast %cst : f32 to vector<4x512xf32>
    %c0 = arith.constant 0 : index
    %c0_0 = arith.constant 0 : index
    %1 = vector.load %arg8[%c0, %c0_0] : memref<4x512xf32, #tpu.memory_space<vmem>>, vector<4x512xf32>
    tpu.vector_store %arg8[%c0, %c0_0], %0 {strides = array<i32>} : memref<4x512xf32, #tpu.memory_space<vmem>>, vector<4x512xf32>,
    %c0_1 = arith.constant 0 : index
    %c0_2 = arith.constant 0 : index
    %c0_3 = arith.constant 0 : index
    %2 = vector.load %arg1[%c0_1, %c0_2, %c0_3] : memref<1x4x256xf32, #tpu.memory_space<vmem>>, vector<1x4x256xf32>
    %3 = vector.shape_cast %2 : vector<1x4x256xf32> to vector<4x256xf32>
    %c0_4 = arith.constant 0 : index
    %c128 = arith.constant 128 : index
    %4 = vector.load %arg8[%c0_4, %c128] : memref<4x512xf32, #tpu.memory_space<vmem>>, vector<4x256xf32>
    tpu.vector_store %arg8[%c0_4, %c128], %3 {strides = array<i32>} : memref<4x512xf32, #tpu.memory_space<vmem>>, vector<4x256xf32>,
    %5 = tpu.iota {dimensions = array<i32: 1>} : vector<1x256xi32>
    %c16_i32 = arith.constant 16 : i32
    %c0_i32 = arith.constant 0 : i32
    %6 = arith.cmpi eq, %c16_i32, %c0_i32 : i32
    %c1_i32 = arith.constant 1 : i32
    %7 = arith.select %6, %c1_i32, %c16_i32 : i32
    %8 = vector.broadcast %7 : i32 to vector<1x256xi32>
    %9 = arith.remsi %5, %8 : vector<1x256xi32>
    %c0_i32_5 = arith.constant 0 : i32
    %10 = vector.broadcast %c0_i32_5 : i32 to vector<1x256xi32>
    %11 = arith.cmpi ne, %9, %10 : vector<1x256xi32>
    %c0_i32_6 = arith.constant 0 : i32
    %12 = vector.broadcast %c0_i32_6 : i32 to vector<1x256xi32>
    %13 = arith.cmpi slt, %9, %12 : vector<1x256xi32>
    %c0_i32_7 = arith.constant 0 : i32
    %14 = arith.cmpi slt, %7, %c0_i32_7 : i32
    %15 = vector.broadcast %14 : i1 to vector<1x256xi1>
    %16 = vector.broadcast %15 : vector<1x256xi1> to vector<1x256xi1>
    %17 = arith.xori %13, %16 : vector<1x256xi1>
    %18 = arith.andi %17, %11 : vector<1x256xi1>
    %19 = vector.broadcast %7 : i32 to vector<1x256xi32>
    %20 = arith.addi %9, %19 : vector<1x256xi32>
    %21 = arith.select %18, %20, %9 : vector<1x256xi1>, vector<1x256xi32>
    %c0_i32_8 = arith.constant 0 : i32
    %22 = vector.broadcast %c0_i32_8 : i32 to vector<1x256xi32>
    %23 = arith.cmpi ne, %21, %22 : vector<1x256xi32>
    %c15_i32 = arith.constant 15 : i32
    %24 = vector.broadcast %c15_i32 : i32 to vector<1x256xi32>
    %25 = arith.cmpi ne, %21, %24 : vector<1x256xi32>
    %c0_9 = arith.constant 0 : index
    %c111 = arith.constant 111 : index
    %26 = vector.load %arg8[%c0_9, %c111] : memref<4x512xf32, #tpu.memory_space<vmem>>, vector<4x256xf32>
    %cst_10 = arith.constant 0.000000e+00 : f32
    %27 = vector.shape_cast %23 : vector<1x256xi1> to vector<1x256xi1>
    %28 = vector.broadcast %27 : vector<1x256xi1> to vector<4x256xi1>
    %29 = vector.broadcast %cst_10 : f32 to vector<4x256xf32>
    %30 = arith.select %28, %26, %29 : vector<4x256xi1>, vector<4x256xf32>
    %c0_11 = arith.constant 0 : index
    %c0_12 = arith.constant 0 : index
    %c0_13 = arith.constant 0 : index
    %31 = vector.load %arg2[%c0_11, %c0_12, %c0_13] : memref<9x8x4xf32, #tpu.memory_space<vmem>>, vector<1x8x4xf32>
    %32 = vector.shape_cast %31 : vector<1x8x4xf32> to vector<8x4xf32>
    %cst_14 = arith.constant dense<0.000000e+00> : vector<8x256xf32>
    %33 = tpu.matmul %32, %30, %cst_14 {dimension_numbers = #tpu.dot_dimension_numbers<[1], [0], [0], [1], [0, 0, 1, 1], [], []>} : vector<8x4xf32>, vector<4x256xf32>, vector<8x256xf32> -> vector<8x256xf32>
    %c0_15 = arith.constant 0 : index
    %c112 = arith.constant 112 : index
    %34 = vector.load %arg8[%c0_15, %c112] : memref<4x512xf32, #tpu.memory_space<vmem>>, vector<4x256xf32>
    %c1 = arith.constant 1 : index
    %c0_16 = arith.constant 0 : index
    %c0_17 = arith.constant 0 : index
    %35 = vector.load %arg2[%c1, %c0_16, %c0_17] : memref<9x8x4xf32, #tpu.memory_space<vmem>>, vector<1x8x4xf32>
    %36 = vector.shape_cast %35 : vector<1x8x4xf32> to vector<8x4xf32>
    %cst_18 = arith.constant dense<0.000000e+00> : vector<8x256xf32>
    %37 = tpu.matmul %36, %34, %cst_18 {dimension_numbers = #tpu.dot_dimension_numbers<[1], [0], [0], [1], [0, 0, 1, 1], [], []>} : vector<8x4xf32>, vector<4x256xf32>, vector<8x256xf32> -> vector<8x256xf32>
    %38 = arith.addf %33, %37 : vector<8x256xf32>
    %c0_19 = arith.constant 0 : index
    %c113 = arith.constant 113 : index
    %39 = vector.load %arg8[%c0_19, %c113] : memref<4x512xf32, #tpu.memory_space<vmem>>, vector<4x256xf32>
    %cst_20 = arith.constant 0.000000e+00 : f32
    %40 = vector.shape_cast %25 : vector<1x256xi1> to vector<1x256xi1>
    %41 = vector.broadcast %40 : vector<1x256xi1> to vector<4x256xi1>
    %42 = vector.broadcast %cst_20 : f32 to vector<4x256xf32>
    %43 = arith.select %41, %39, %42 : vector<4x256xi1>, vector<4x256xf32>
    %c2 = arith.constant 2 : index
    %c0_21 = arith.constant 0 : index
    %c0_22 = arith.constant 0 : index
    %44 = vector.load %arg2[%c2, %c0_21, %c0_22] : memref<9x8x4xf32, #tpu.memory_space<vmem>>, vector<1x8x4xf32>
    %45 = vector.shape_cast %44 : vector<1x8x4xf32> to vector<8x4xf32>
    %cst_23 = arith.constant dense<0.000000e+00> : vector<8x256xf32>
    %46 = tpu.matmul %45, %43, %cst_23 {dimension_numbers = #tpu.dot_dimension_numbers<[1], [0], [0], [1], [0, 0, 1, 1], [], []>} : vector<8x4xf32>, vector<4x256xf32>, vector<8x256xf32> -> vector<8x256xf32>
    %47 = arith.addf %38, %46 : vector<8x256xf32>
    %c0_24 = arith.constant 0 : index
    %c127 = arith.constant 127 : index
    %48 = vector.load %arg8[%c0_24, %c127] : memref<4x512xf32, #tpu.memory_space<vmem>>, vector<4x256xf32>
    %cst_25 = arith.constant 0.000000e+00 : f32
    %49 = vector.shape_cast %23 : vector<1x256xi1> to vector<1x256xi1>
    %50 = vector.broadcast %49 : vector<1x256xi1> to vector<4x256xi1>
    %51 = vector.broadcast %cst_25 : f32 to vector<4x256xf32>
    %52 = arith.select %50, %48, %51 : vector<4x256xi1>, vector<4x256xf32>
    %c3 = arith.constant 3 : index
    %c0_26 = arith.constant 0 : index
    %c0_27 = arith.constant 0 : index
    %53 = vector.load %arg2[%c3, %c0_26, %c0_27] : memref<9x8x4xf32, #tpu.memory_space<vmem>>, vector<1x8x4xf32>
    %54 = vector.shape_cast %53 : vector<1x8x4xf32> to vector<8x4xf32>
    %cst_28 = arith.constant dense<0.000000e+00> : vector<8x256xf32>
    %55 = tpu.matmul %54, %52, %cst_28 {dimension_numbers = #tpu.dot_dimension_numbers<[1], [0], [0], [1], [0, 0, 1, 1], [], []>} : vector<8x4xf32>, vector<4x256xf32>, vector<8x256xf32> -> vector<8x256xf32>
    %56 = arith.addf %47, %55 : vector<8x256xf32>
    %c0_29 = arith.constant 0 : index
    %c128_30 = arith.constant 128 : index
    %57 = vector.load %arg8[%c0_29, %c128_30] : memref<4x512xf32, #tpu.memory_space<vmem>>, vector<4x256xf32>
    %c4 = arith.constant 4 : index
    %c0_31 = arith.constant 0 : index
    %c0_32 = arith.constant 0 : index
    %58 = vector.load %arg2[%c4, %c0_31, %c0_32] : memref<9x8x4xf32, #tpu.memory_space<vmem>>, vector<1x8x4xf32>
    %59 = vector.shape_cast %58 : vector<1x8x4xf32> to vector<8x4xf32>
    %cst_33 = arith.constant dense<0.000000e+00> : vector<8x256xf32>
    %60 = tpu.matmul %59, %57, %cst_33 {dimension_numbers = #tpu.dot_dimension_numbers<[1], [0], [0], [1], [0, 0, 1, 1], [], []>} : vector<8x4xf32>, vector<4x256xf32>, vector<8x256xf32> -> vector<8x256xf32>
    %61 = arith.addf %56, %60 : vector<8x256xf32>
    %c0_34 = arith.constant 0 : index
    %c129 = arith.constant 129 : index
    %62 = vector.load %arg8[%c0_34, %c129] : memref<4x512xf32, #tpu.memory_space<vmem>>, vector<4x256xf32>
    %cst_35 = arith.constant 0.000000e+00 : f32
    %63 = vector.shape_cast %25 : vector<1x256xi1> to vector<1x256xi1>
    %64 = vector.broadcast %63 : vector<1x256xi1> to vector<4x256xi1>
    %65 = vector.broadcast %cst_35 : f32 to vector<4x256xf32>
    %66 = arith.select %64, %62, %65 : vector<4x256xi1>, vector<4x256xf32>
    %c5 = arith.constant 5 : index
    %c0_36 = arith.constant 0 : index
    %c0_37 = arith.constant 0 : index
    %67 = vector.load %arg2[%c5, %c0_36, %c0_37] : memref<9x8x4xf32, #tpu.memory_space<vmem>>, vector<1x8x4xf32>
    %68 = vector.shape_cast %67 : vector<1x8x4xf32> to vector<8x4xf32>
    %cst_38 = arith.constant dense<0.000000e+00> : vector<8x256xf32>
    %69 = tpu.matmul %68, %66, %cst_38 {dimension_numbers = #tpu.dot_dimension_numbers<[1], [0], [0], [1], [0, 0, 1, 1], [], []>} : vector<8x4xf32>, vector<4x256xf32>, vector<8x256xf32> -> vector<8x256xf32>
    %70 = arith.addf %61, %69 : vector<8x256xf32>
    %c0_39 = arith.constant 0 : index
    %c143 = arith.constant 143 : index
    %71 = vector.load %arg8[%c0_39, %c143] : memref<4x512xf32, #tpu.memory_space<vmem>>, vector<4x256xf32>
    %cst_40 = arith.constant 0.000000e+00 : f32
    %72 = vector.shape_cast %23 : vector<1x256xi1> to vector<1x256xi1>
    %73 = vector.broadcast %72 : vector<1x256xi1> to vector<4x256xi1>
    %74 = vector.broadcast %cst_40 : f32 to vector<4x256xf32>
    %75 = arith.select %73, %71, %74 : vector<4x256xi1>, vector<4x256xf32>
    %c6 = arith.constant 6 : index
    %c0_41 = arith.constant 0 : index
    %c0_42 = arith.constant 0 : index
    %76 = vector.load %arg2[%c6, %c0_41, %c0_42] : memref<9x8x4xf32, #tpu.memory_space<vmem>>, vector<1x8x4xf32>
    %77 = vector.shape_cast %76 : vector<1x8x4xf32> to vector<8x4xf32>
    %cst_43 = arith.constant dense<0.000000e+00> : vector<8x256xf32>
    %78 = tpu.matmul %77, %75, %cst_43 {dimension_numbers = #tpu.dot_dimension_numbers<[1], [0], [0], [1], [0, 0, 1, 1], [], []>} : vector<8x4xf32>, vector<4x256xf32>, vector<8x256xf32> -> vector<8x256xf32>
    %79 = arith.addf %70, %78 : vector<8x256xf32>
    %c0_44 = arith.constant 0 : index
    %c144 = arith.constant 144 : index
    %80 = vector.load %arg8[%c0_44, %c144] : memref<4x512xf32, #tpu.memory_space<vmem>>, vector<4x256xf32>
    %c7 = arith.constant 7 : index
    %c0_45 = arith.constant 0 : index
    %c0_46 = arith.constant 0 : index
    %81 = vector.load %arg2[%c7, %c0_45, %c0_46] : memref<9x8x4xf32, #tpu.memory_space<vmem>>, vector<1x8x4xf32>
    %82 = vector.shape_cast %81 : vector<1x8x4xf32> to vector<8x4xf32>
    %cst_47 = arith.constant dense<0.000000e+00> : vector<8x256xf32>
    %83 = tpu.matmul %82, %80, %cst_47 {dimension_numbers = #tpu.dot_dimension_numbers<[1], [0], [0], [1], [0, 0, 1, 1], [], []>} : vector<8x4xf32>, vector<4x256xf32>, vector<8x256xf32> -> vector<8x256xf32>
    %84 = arith.addf %79, %83 : vector<8x256xf32>
    %c0_48 = arith.constant 0 : index
    %c145 = arith.constant 145 : index
    %85 = vector.load %arg8[%c0_48, %c145] : memref<4x512xf32, #tpu.memory_space<vmem>>, vector<4x256xf32>
    %cst_49 = arith.constant 0.000000e+00 : f32
    %86 = vector.shape_cast %25 : vector<1x256xi1> to vector<1x256xi1>
    %87 = vector.broadcast %86 : vector<1x256xi1> to vector<4x256xi1>
    %88 = vector.broadcast %cst_49 : f32 to vector<4x256xf32>
    %89 = arith.select %87, %85, %88 : vector<4x256xi1>, vector<4x256xf32>
    %c8 = arith.constant 8 : index
    %c0_50 = arith.constant 0 : index
    %c0_51 = arith.constant 0 : index
    %90 = vector.load %arg2[%c8, %c0_50, %c0_51] : memref<9x8x4xf32, #tpu.memory_space<vmem>>, vector<1x8x4xf32>
    %91 = vector.shape_cast %90 : vector<1x8x4xf32> to vector<8x4xf32>
    %cst_52 = arith.constant dense<0.000000e+00> : vector<8x256xf32>
    %92 = tpu.matmul %91, %89, %cst_52 {dimension_numbers = #tpu.dot_dimension_numbers<[1], [0], [0], [1], [0, 0, 1, 1], [], []>} : vector<8x4xf32>, vector<4x256xf32>, vector<8x256xf32> -> vector<8x256xf32>
    %93 = arith.addf %84, %92 : vector<8x256xf32>
    %c0_53 = arith.constant 0 : index
    %c0_54 = arith.constant 0 : index
    %94 = vector.load %arg3[%c0_53, %c0_54] : memref<8x1xf32, #tpu.memory_space<vmem>>, vector<8x1xf32>
    %95 = vector.broadcast %94 : vector<8x1xf32> to vector<8x256xf32>
    %96 = arith.addf %93, %95 : vector<8x256xf32>
    %cst_55 = arith.constant 0.000000e+00 : f32
    %97 = vector.broadcast %cst_55 : f32 to vector<8x256xf32>
    %98 = arith.cmpf oge, %96, %97 : vector<8x256xf32>
    %cst_56 = arith.constant 0.00999999977 : f32
    %99 = vector.broadcast %cst_56 : f32 to vector<8x256xf32>
    %100 = arith.mulf %99, %96 : vector<8x256xf32>
    %101 = arith.select %98, %96, %100 : vector<8x256xi1>, vector<8x256xf32>
    %c0_57 = arith.constant 0 : index
    %c0_58 = arith.constant 0 : index
    %102 = vector.load %arg4[%c0_57, %c0_58] : memref<256x64xf32, #tpu.memory_space<vmem>>, vector<256x64xf32>
    %cst_59 = arith.constant dense<0.000000e+00> : vector<8x64xf32>
    %103 = tpu.matmul %101, %102, %cst_59 {dimension_numbers = #tpu.dot_dimension_numbers<[1], [0], [0], [1], [0, 0, 1, 1], [], []>} : vector<8x256xf32>, vector<256x64xf32>, vector<8x64xf32> -> vector<8x64xf32>
    %cst_60 = arith.constant 0.000000e+00 : f32
    %104 = vector.broadcast %cst_60 : f32 to vector<8x320xf32>
    %c0_61 = arith.constant 0 : index
    %c0_62 = arith.constant 0 : index
    %105 = vector.load %arg9[%c0_61, %c0_62] : memref<8x320xf32, #tpu.memory_space<vmem>>, vector<8x320xf32>
    tpu.vector_store %arg9[%c0_61, %c0_62], %104 {strides = array<i32>} : memref<8x320xf32, #tpu.memory_space<vmem>>, vector<8x320xf32>,
    %c0_63 = arith.constant 0 : index
    %c128_64 = arith.constant 128 : index
    %106 = vector.load %arg9[%c0_63, %c128_64] : memref<8x320xf32, #tpu.memory_space<vmem>>, vector<8x64xf32>
    tpu.vector_store %arg9[%c0_63, %c128_64], %103 {strides = array<i32>} : memref<8x320xf32, #tpu.memory_space<vmem>>, vector<8x64xf32>,
    %107 = tpu.iota {dimensions = array<i32: 1>} : vector<1x64xi32>
    %c8_i32 = arith.constant 8 : i32
    %c0_i32_65 = arith.constant 0 : i32
    %108 = arith.cmpi eq, %c8_i32, %c0_i32_65 : i32
    %c1_i32_66 = arith.constant 1 : i32
    %109 = arith.select %108, %c1_i32_66, %c8_i32 : i32
    %110 = vector.broadcast %109 : i32 to vector<1x64xi32>
    %111 = arith.remsi %107, %110 : vector<1x64xi32>
    %c0_i32_67 = arith.constant 0 : i32
    %112 = vector.broadcast %c0_i32_67 : i32 to vector<1x64xi32>
    %113 = arith.cmpi ne, %111, %112 : vector<1x64xi32>
    %c0_i32_68 = arith.constant 0 : i32
    %114 = vector.broadcast %c0_i32_68 : i32 to vector<1x64xi32>
    %115 = arith.cmpi slt, %111, %114 : vector<1x64xi32>
    %c0_i32_69 = arith.constant 0 : i32
    %116 = arith.cmpi slt, %109, %c0_i32_69 : i32
    %117 = vector.broadcast %116 : i1 to vector<1x64xi1>
    %118 = vector.broadcast %117 : vector<1x64xi1> to vector<1x64xi1>
    %119 = arith.xori %115, %118 : vector<1x64xi1>
    %120 = arith.andi %119, %113 : vector<1x64xi1>
    %121 = vector.broadcast %109 : i32 to vector<1x64xi32>
    %122 = arith.addi %111, %121 : vector<1x64xi32>
    %123 = arith.select %120, %122, %111 : vector<1x64xi1>, vector<1x64xi32>
    %c0_i32_70 = arith.constant 0 : i32
    %124 = vector.broadcast %c0_i32_70 : i32 to vector<1x64xi32>
    %125 = arith.cmpi ne, %123, %124 : vector<1x64xi32>
    %c7_i32 = arith.constant 7 : i32
    %126 = vector.broadcast %c7_i32 : i32 to vector<1x64xi32>
    %127 = arith.cmpi ne, %123, %126 : vector<1x64xi32>
    %c0_71 = arith.constant 0 : index
    %c119 = arith.constant 119 : index
    %128 = vector.load %arg9[%c0_71, %c119] : memref<8x320xf32, #tpu.memory_space<vmem>>, vector<8x64xf32>
    %cst_72 = arith.constant 0.000000e+00 : f32
    %129 = vector.shape_cast %125 : vector<1x64xi1> to vector<1x64xi1>
    %130 = vector.broadcast %129 : vector<1x64xi1> to vector<8x64xi1>
    %131 = vector.broadcast %cst_72 : f32 to vector<8x64xf32>
    %132 = arith.select %130, %128, %131 : vector<8x64xi1>, vector<8x64xf32>
    %c0_73 = arith.constant 0 : index
    %c0_74 = arith.constant 0 : index
    %c0_75 = arith.constant 0 : index
    %133 = vector.load %arg5[%c0_73, %c0_74, %c0_75] : memref<9x16x8xf32, #tpu.memory_space<vmem>>, vector<1x16x8xf32>
    %134 = vector.shape_cast %133 : vector<1x16x8xf32> to vector<16x8xf32>
    %cst_76 = arith.constant dense<0.000000e+00> : vector<16x64xf32>
    %135 = tpu.matmul %134, %132, %cst_76 {dimension_numbers = #tpu.dot_dimension_numbers<[1], [0], [0], [1], [0, 0, 1, 1], [], []>} : vector<16x8xf32>, vector<8x64xf32>, vector<16x64xf32> -> vector<16x64xf32>
    %c0_77 = arith.constant 0 : index
    %c120 = arith.constant 120 : index
    %136 = vector.load %arg9[%c0_77, %c120] : memref<8x320xf32, #tpu.memory_space<vmem>>, vector<8x64xf32>
    %c1_78 = arith.constant 1 : index
    %c0_79 = arith.constant 0 : index
    %c0_80 = arith.constant 0 : index
    %137 = vector.load %arg5[%c1_78, %c0_79, %c0_80] : memref<9x16x8xf32, #tpu.memory_space<vmem>>, vector<1x16x8xf32>
    %138 = vector.shape_cast %137 : vector<1x16x8xf32> to vector<16x8xf32>
    %cst_81 = arith.constant dense<0.000000e+00> : vector<16x64xf32>
    %139 = tpu.matmul %138, %136, %cst_81 {dimension_numbers = #tpu.dot_dimension_numbers<[1], [0], [0], [1], [0, 0, 1, 1], [], []>} : vector<16x8xf32>, vector<8x64xf32>, vector<16x64xf32> -> vector<16x64xf32>
    %140 = arith.addf %135, %139 : vector<16x64xf32>
    %c0_82 = arith.constant 0 : index
    %c121 = arith.constant 121 : index
    %141 = vector.load %arg9[%c0_82, %c121] : memref<8x320xf32, #tpu.memory_space<vmem>>, vector<8x64xf32>
    %cst_83 = arith.constant 0.000000e+00 : f32
    %142 = vector.shape_cast %127 : vector<1x64xi1> to vector<1x64xi1>
    %143 = vector.broadcast %142 : vector<1x64xi1> to vector<8x64xi1>
    %144 = vector.broadcast %cst_83 : f32 to vector<8x64xf32>
    %145 = arith.select %143, %141, %144 : vector<8x64xi1>, vector<8x64xf32>
    %c2_84 = arith.constant 2 : index
    %c0_85 = arith.constant 0 : index
    %c0_86 = arith.constant 0 : index
    %146 = vector.load %arg5[%c2_84, %c0_85, %c0_86] : memref<9x16x8xf32, #tpu.memory_space<vmem>>, vector<1x16x8xf32>
    %147 = vector.shape_cast %146 : vector<1x16x8xf32> to vector<16x8xf32>
    %cst_87 = arith.constant dense<0.000000e+00> : vector<16x64xf32>
    %148 = tpu.matmul %147, %145, %cst_87 {dimension_numbers = #tpu.dot_dimension_numbers<[1], [0], [0], [1], [0, 0, 1, 1], [], []>} : vector<16x8xf32>, vector<8x64xf32>, vector<16x64xf32> -> vector<16x64xf32>
    %149 = arith.addf %140, %148 : vector<16x64xf32>
    %c0_88 = arith.constant 0 : index
    %c127_89 = arith.constant 127 : index
    %150 = vector.load %arg9[%c0_88, %c127_89] : memref<8x320xf32, #tpu.memory_space<vmem>>, vector<8x64xf32>
    %cst_90 = arith.constant 0.000000e+00 : f32
    %151 = vector.shape_cast %125 : vector<1x64xi1> to vector<1x64xi1>
    %152 = vector.broadcast %151 : vector<1x64xi1> to vector<8x64xi1>
    %153 = vector.broadcast %cst_90 : f32 to vector<8x64xf32>
    %154 = arith.select %152, %150, %153 : vector<8x64xi1>, vector<8x64xf32>
    %c3_91 = arith.constant 3 : index
    %c0_92 = arith.constant 0 : index
    %c0_93 = arith.constant 0 : index
    %155 = vector.load %arg5[%c3_91, %c0_92, %c0_93] : memref<9x16x8xf32, #tpu.memory_space<vmem>>, vector<1x16x8xf32>
    %156 = vector.shape_cast %155 : vector<1x16x8xf32> to vector<16x8xf32>
    %cst_94 = arith.constant dense<0.000000e+00> : vector<16x64xf32>
    %157 = tpu.matmul %156, %154, %cst_94 {dimension_numbers = #tpu.dot_dimension_numbers<[1], [0], [0], [1], [0, 0, 1, 1], [], []>} : vector<16x8xf32>, vector<8x64xf32>, vector<16x64xf32> -> vector<16x64xf32>
    %158 = arith.addf %149, %157 : vector<16x64xf32>
    %c0_95 = arith.constant 0 : index
    %c128_96 = arith.constant 128 : index
    %159 = vector.load %arg9[%c0_95, %c128_96] : memref<8x320xf32, #tpu.memory_space<vmem>>, vector<8x64xf32>
    %c4_97 = arith.constant 4 : index
    %c0_98 = arith.constant 0 : index
    %c0_99 = arith.constant 0 : index
    %160 = vector.load %arg5[%c4_97, %c0_98, %c0_99] : memref<9x16x8xf32, #tpu.memory_space<vmem>>, vector<1x16x8xf32>
    %161 = vector.shape_cast %160 : vector<1x16x8xf32> to vector<16x8xf32>
    %cst_100 = arith.constant dense<0.000000e+00> : vector<16x64xf32>
    %162 = tpu.matmul %161, %159, %cst_100 {dimension_numbers = #tpu.dot_dimension_numbers<[1], [0], [0], [1], [0, 0, 1, 1], [], []>} : vector<16x8xf32>, vector<8x64xf32>, vector<16x64xf32> -> vector<16x64xf32>
    %163 = arith.addf %158, %162 : vector<16x64xf32>
    %c0_101 = arith.constant 0 : index
    %c129_102 = arith.constant 129 : index
    %164 = vector.load %arg9[%c0_101, %c129_102] : memref<8x320xf32, #tpu.memory_space<vmem>>, vector<8x64xf32>
    %cst_103 = arith.constant 0.000000e+00 : f32
    %165 = vector.shape_cast %127 : vector<1x64xi1> to vector<1x64xi1>
    %166 = vector.broadcast %165 : vector<1x64xi1> to vector<8x64xi1>
    %167 = vector.broadcast %cst_103 : f32 to vector<8x64xf32>
    %168 = arith.select %166, %164, %167 : vector<8x64xi1>, vector<8x64xf32>
    %c5_104 = arith.constant 5 : index
    %c0_105 = arith.constant 0 : index
    %c0_106 = arith.constant 0 : index
    %169 = vector.load %arg5[%c5_104, %c0_105, %c0_106] : memref<9x16x8xf32, #tpu.memory_space<vmem>>, vector<1x16x8xf32>
    %170 = vector.shape_cast %169 : vector<1x16x8xf32> to vector<16x8xf32>
    %cst_107 = arith.constant dense<0.000000e+00> : vector<16x64xf32>
    %171 = tpu.matmul %170, %168, %cst_107 {dimension_numbers = #tpu.dot_dimension_numbers<[1], [0], [0], [1], [0, 0, 1, 1], [], []>} : vector<16x8xf32>, vector<8x64xf32>, vector<16x64xf32> -> vector<16x64xf32>
    %172 = arith.addf %163, %171 : vector<16x64xf32>
    %c0_108 = arith.constant 0 : index
    %c135 = arith.constant 135 : index
    %173 = vector.load %arg9[%c0_108, %c135] : memref<8x320xf32, #tpu.memory_space<vmem>>, vector<8x64xf32>
    %cst_109 = arith.constant 0.000000e+00 : f32
    %174 = vector.shape_cast %125 : vector<1x64xi1> to vector<1x64xi1>
    %175 = vector.broadcast %174 : vector<1x64xi1> to vector<8x64xi1>
    %176 = vector.broadcast %cst_109 : f32 to vector<8x64xf32>
    %177 = arith.select %175, %173, %176 : vector<8x64xi1>, vector<8x64xf32>
    %c6_110 = arith.constant 6 : index
    %c0_111 = arith.constant 0 : index
    %c0_112 = arith.constant 0 : index
    %178 = vector.load %arg5[%c6_110, %c0_111, %c0_112] : memref<9x16x8xf32, #tpu.memory_space<vmem>>, vector<1x16x8xf32>
    %179 = vector.shape_cast %178 : vector<1x16x8xf32> to vector<16x8xf32>
    %cst_113 = arith.constant dense<0.000000e+00> : vector<16x64xf32>
    %180 = tpu.matmul %179, %177, %cst_113 {dimension_numbers = #tpu.dot_dimension_numbers<[1], [0], [0], [1], [0, 0, 1, 1], [], []>} : vector<16x8xf32>, vector<8x64xf32>, vector<16x64xf32> -> vector<16x64xf32>
    %181 = arith.addf %172, %180 : vector<16x64xf32>
    %c0_114 = arith.constant 0 : index
    %c136 = arith.constant 136 : index
    %182 = vector.load %arg9[%c0_114, %c136] : memref<8x320xf32, #tpu.memory_space<vmem>>, vector<8x64xf32>
    %c7_115 = arith.constant 7 : index
    %c0_116 = arith.constant 0 : index
    %c0_117 = arith.constant 0 : index
    %183 = vector.load %arg5[%c7_115, %c0_116, %c0_117] : memref<9x16x8xf32, #tpu.memory_space<vmem>>, vector<1x16x8xf32>
    %184 = vector.shape_cast %183 : vector<1x16x8xf32> to vector<16x8xf32>
    %cst_118 = arith.constant dense<0.000000e+00> : vector<16x64xf32>
    %185 = tpu.matmul %184, %182, %cst_118 {dimension_numbers = #tpu.dot_dimension_numbers<[1], [0], [0], [1], [0, 0, 1, 1], [], []>} : vector<16x8xf32>, vector<8x64xf32>, vector<16x64xf32> -> vector<16x64xf32>
    %186 = arith.addf %181, %185 : vector<16x64xf32>
    %c0_119 = arith.constant 0 : index
    %c137 = arith.constant 137 : index
    %187 = vector.load %arg9[%c0_119, %c137] : memref<8x320xf32, #tpu.memory_space<vmem>>, vector<8x64xf32>
    %cst_120 = arith.constant 0.000000e+00 : f32
    %188 = vector.shape_cast %127 : vector<1x64xi1> to vector<1x64xi1>
    %189 = vector.broadcast %188 : vector<1x64xi1> to vector<8x64xi1>
    %190 = vector.broadcast %cst_120 : f32 to vector<8x64xf32>
    %191 = arith.select %189, %187, %190 : vector<8x64xi1>, vector<8x64xf32>
    %c8_121 = arith.constant 8 : index
    %c0_122 = arith.constant 0 : index
    %c0_123 = arith.constant 0 : index
    %192 = vector.load %arg5[%c8_121, %c0_122, %c0_123] : memref<9x16x8xf32, #tpu.memory_space<vmem>>, vector<1x16x8xf32>
    %193 = vector.shape_cast %192 : vector<1x16x8xf32> to vector<16x8xf32>
    %cst_124 = arith.constant dense<0.000000e+00> : vector<16x64xf32>
    %194 = tpu.matmul %193, %191, %cst_124 {dimension_numbers = #tpu.dot_dimension_numbers<[1], [0], [0], [1], [0, 0, 1, 1], [], []>} : vector<16x8xf32>, vector<8x64xf32>, vector<16x64xf32> -> vector<16x64xf32>
    %195 = arith.addf %186, %194 : vector<16x64xf32>
    %c0_125 = arith.constant 0 : index
    %c0_126 = arith.constant 0 : index
    %196 = vector.load %arg6[%c0_125, %c0_126] : memref<16x1xf32, #tpu.memory_space<vmem>>, vector<16x1xf32>
    %197 = vector.broadcast %196 : vector<16x1xf32> to vector<16x64xf32>
    %198 = arith.addf %195, %197 : vector<16x64xf32>
    %cst_127 = arith.constant 0.000000e+00 : f32
    %199 = vector.broadcast %cst_127 : f32 to vector<16x64xf32>
    %200 = arith.cmpf oge, %198, %199 : vector<16x64xf32>
    %cst_128 = arith.constant 0.00999999977 : f32
    %201 = vector.broadcast %cst_128 : f32 to vector<16x64xf32>
    %202 = arith.mulf %201, %198 : vector<16x64xf32>
    %203 = arith.select %200, %198, %202 : vector<16x64xi1>, vector<16x64xf32>
    %c0_129 = arith.constant 0 : index
    %c0_130 = arith.constant 0 : index
    %c0_131 = arith.constant 0 : index
    %204 = vector.load %arg7[%c0_129, %c0_130, %c0_131] : memref<1x16x64xf32, #tpu.memory_space<vmem>>, vector<1x16x64xf32>
    %205 = vector.shape_cast %204 : vector<1x16x64xf32> to vector<16x64xf32>
    %206 = vector.shape_cast %203 : vector<16x64xf32> to vector<1x16x64xf32>
    tpu.vector_store %arg7[%c0_129, %c0_130, %c0_131], %206 {strides = array<i32>} : memref<1x16x64xf32, #tpu.memory_space<vmem>>, vector<1x16x64xf32>,
    return
  }
  func.func @transform_0(%arg0: i32) -> (i32, i32, i32) {
    %c0_i32 = arith.constant 0 : i32
    %c0_i32_0 = arith.constant 0 : i32
    %c0_i32_1 = arith.constant 0 : i32
    return %arg0, %c0_i32, %c0_i32_0 : i32, i32, i32
  }
  func.func @transform_1(%arg0: i32) -> (i32, i32, i32) {
    %c0_i32 = arith.constant 0 : i32
    %c0_i32_0 = arith.constant 0 : i32
    %c0_i32_1 = arith.constant 0 : i32
    %c0_i32_2 = arith.constant 0 : i32
    return %c0_i32, %c0_i32_0, %c0_i32_1 : i32, i32, i32
  }
  func.func @transform_2(%arg0: i32) -> (i32, i32) {
    %c0_i32 = arith.constant 0 : i32
    %c0_i32_0 = arith.constant 0 : i32
    %c0_i32_1 = arith.constant 0 : i32
    return %c0_i32, %c0_i32_0 : i32, i32
  }
  func.func @transform_3(%arg0: i32) -> (i32, i32) {
    %c0_i32 = arith.constant 0 : i32
    %c0_i32_0 = arith.constant 0 : i32
    %c0_i32_1 = arith.constant 0 : i32
    return %c0_i32, %c0_i32_0 : i32, i32
  }
  func.func @transform_4(%arg0: i32) -> (i32, i32, i32) {
    %c0_i32 = arith.constant 0 : i32
    %c0_i32_0 = arith.constant 0 : i32
    %c0_i32_1 = arith.constant 0 : i32
    %c0_i32_2 = arith.constant 0 : i32
    return %c0_i32, %c0_i32_0, %c0_i32_1 : i32, i32, i32
  }
  func.func @transform_5(%arg0: i32) -> (i32, i32) {
    %c0_i32 = arith.constant 0 : i32
    %c0_i32_0 = arith.constant 0 : i32
    %c0_i32_1 = arith.constant 0 : i32
    return %c0_i32, %c0_i32_0 : i32, i32
  }
  func.func @transform_6(%arg0: i32) -> (i32, i32, i32) {
    %c0_i32 = arith.constant 0 : i32
    %c0_i32_0 = arith.constant 0 : i32
    %c0_i32_1 = arith.constant 0 : i32
    return %arg0, %c0_i32, %c0_i32_0 : i32, i32, i32
  }
}

</mosaic_0001>

<bundles_post_ra>
// kernel: convolutional_kernel_forward.1
= control target key start
LH: loop header
LB: loop body
LE: loop exit
PB: predicated region body
PF: predicated region fallthrough
CT: control target
= control target key end

     0   :  { %s2492_s21 = smov 0   ;;  %s2872_s0 = inlined_call_operand.vmem [shape: f32[2,4,256], index: 0, kind: input, shape index: {}]   ;;  %s2873_s1 = inlined_call_operand.vmem [shape: f32[9,8,4], index: 1, kind: input, shape index: {}]   ;;  %s2874_s2 = inlined_call_operand.vmem [shape: f32[8,1], index: 2, kind: input, shape index: {}]   ;;  %s2875_s3 = inlined_call_operand.vmem [shape: f32[256,64], index: 3, kind: input, shape index: {}]   ;;  %s2876_s4 = inlined_call_operand.vmem [shape: f32[9,16,8], index: 4, kind: input, shape index: {}]   ;;  %s2877_s5 = inlined_call_operand.vmem [shape: f32[16,1], index: 5, kind: input, shape index: {}]   ;;  %s2878_s6 = inlined_call_operand.vmem [shape: f32[2,16,64], index: 6, kind: output, shape index: {}]  }
   0x1 LB: > { %s2210_s22 = sadd.s32 4294967295, %s2439_s21   ;;  %p2214_p0 = scmp.ge.s32.totalorder %s2439_s21, 1  ;;  %s2439_s21 = sphi %s2492_s21, %s16_s21  }
   0x2   : > { %p212_p1 = scmp.lt.s32.totalorder %s2439_s21, 3 }
   0x4   : > { %p213_p2 = pnand %p2214_p0, %p212_p1 }
   0x5   : > { %p242_p3 = scmp.lt.s32.totalorder (!%p213_p2), %s2210_s22, 1  ;;  %s2442_s27 = smov (!%p213_p2), 17  }
   0x6   : > { %216 = sbr.rel (%p213_p2) target bundleno = 945 (0x3b1), region = 44  ;;  %s2443_s28 = smov (!%p213_p2), 16  }
   0x7   : > { %s2444_s29 = smov (!%p213_p2), 15   ;;  %s2445_s30 = smov (!%p213_p2), 1  }
   0x8   : > { %s2446_s7 = smov (!%p213_p2), 127   ;;  %s2447_s8 = smov (!%p213_p2), 113  }
   0x9   : > { %s2448_s9 = smov (!%p213_p2), 112   ;;  %s2450_s10 = smov (!%p213_p2), 111  }
   0xa   : > { %s2451_s15 = smov (!%p213_p2), 9   ;;  %s2452_s16 = smov (!%p213_p2), 7  }
   0xb   : > { %v2441_v0 = vmov 0.0   ;;  %s2892_s22 = smov (!%p242_p3, %s2210_s22), 1  ;;  %v2449_v11 = vmov 0   ;;  %v1176_v13 = vld [vmem:[%s2874_s2] sm:$0xff]  ;;  %v256_v14 = vlaneseq  ;;  %vm302_vm0 = vcmask 138240   ;;  %v2219_v33 = vld [vmem:[%s2873_s1 + $0x8] sm:$0xff] }
   0xc   : > { %252 = vst [vmem:[#allocation2] sm:$0xff] %v2441_v0  ;;  %253 = vst [vmem:[#allocation2 + $0x8] sm:$0xff] %v2441_v0  ;;  %394 = vmatprep.mubr.f32.mxu0 %v2441_v0  ;;  %474 = vmatprep.mubr.f32.mxu1 %v2441_v0  ;;  %s2296_s23 = sshll.u32 %s2892_s22, 3  ;;  %vm318_vm1 = vcmask 130048   ;;  %vm325_vm2 = vcmask 1043456   ;;  %vm321_vm5 = vcmask 31744  }
   0xd   : > { %1293 = vst [vmem:[#allocation3 + $0x8] sm:$0xff] %v2441_v0  ;;  %s246_s26 = scalar_lea.vmem %s2872_s0, %s2296_s23  ;;  %2429 = vset.pattern.permute.xlu0 %v2449_v11  ;;  %2430 = vset.pattern.permute.xlu1 %v2449_v11  ;;  %v2535_v15 = vand.u32 127, %v256_v14  ;;  %vm496_vm6 = vcmask 121856   ;;  %v309_v36 = vld [vmem:[%s2873_s1] sm:$0xff]  ;;  %vm598_vm9 = vcmask 7168   ;;  %v2226_v45 = vld [vmem:[%s2873_s1 + $0x10] sm:$0xff] }
   0xe   : > { %v2511_v1 = vld [vmem:[%s246_s26] sm:$0xff]  ;;  %vm785_vm10 = vcmask 1039360   ;;  %v2230_v52 = vld [vmem:[%s2873_s1 + $0x18] sm:$0xff]  ;;  %v2238_v61 = vld [vmem:[%s2873_s1 + $0x28] sm:$0xff]  ;;  %vm887_vm11 = vcmask 924672   ;;  %vm991_vm12 = vcmask 916480  }
   0xf   : > { %255 = vst [vmem:[#allocation2 + $0x4] sm:$0xff] %v2511_v1  ;;  %v2519_v7 = vcombine.high %v2511_v1, %v2511_v1  ;;  %v258_v18 = vadd.s32 128, %v2535_v15  ;;  %v263_v22 = vand.u32 15, %v2535_v15  ;;  %v2234_v53 = vld [vmem:[%s2873_s1 + $0x20] sm:$0xff]  ;;  %vm1085_vm13 = vcmask 908288   ;;  %v1204_v25 = vld [vmem:[%s2875_s3 + $0x70] sm:$0xff] }
  0x10   : > { %v1219_v26 = vld [vmem:[%s2875_s3 + $0xe8] sm:$0xff]  ;;  %v1198_v37 = vld [vmem:[%s2875_s3 + $0x40] sm:$0xff]  ;;  %v1213_v38 = vld [vmem:[%s2875_s3 + $0xb8] sm:$0xff]  ;;  %s2453_s17 = smov 8   ;;  %s2454_s20 = smov 120  }
  0x11   : > { %v270_v21 = vand.u32 15, %v258_v18  ;;  %vm2543_vm4 = vcmp.ne.s32.totalorder %v263_v22, 0  ;;  %vm2560_vm7 = vcmp.ne.s32.totalorder %v263_v22, 15  ;;  %v2250_v22 = vld [vmem:[%s2873_s1 + $0x40] sm:$0xff]  ;;  %s2455_s25 = smov 121  }
  0x13   : > { %v775_v8 = vld [vmem:[#allocation2 + $0xc] sm:$0xf]  ;;  %vm2539_vm3 = vcmp.ne.s32.totalorder %v270_v21, 0  ;;  %vm2564_vm8 = vcmp.ne.s32.totalorder %v270_v21, 15 }
  0x14   : > { %v877_v9 = vld [vmem:[#allocation2 + $0xc] sm:$0xf] }
  0x15   : > { %v979_v10 = vld [vmem:[#allocation2 + $0xc] sm:$0xf] }
  0x16   : > { %v288_v2 = vld [vmem:[#allocation2 + $0x8] sm:$0xf]  ;;  %v287_v3 = vld [vmem:[#allocation2] sm:$0xff]  ;;  %v1075_v12 = vld [vmem:[#allocation2 + $0xc] sm:$0xf] }
  0x17   : > { %300 = vrot.lane.b32.xlu1 %v288_v2, %s2442_s27  ;;  %316 = vrot.lane.b32.xlu0 %v288_v2, %s2443_s28  ;;  %v482_v4 = vld [vmem:[#allocation2 + $0x8] sm:$0xf]  ;;  %v489_v5 = vcombine.high %v287_v3, %v287_v3 }
  0x18   : > { %v588_v6 = vld [vmem:[#allocation2 + $0x8] sm:$0xf] }
  0x1b   : > { %296 = vrot.lane.b32.xlu1 %v287_v3, %s2442_s27  ;;  %312 = vrot.lane.b32.xlu0 %v287_v3, %s2443_s28 }
  0x1f   : > { %494 = vrot.lane.b32.xlu1 %v482_v4, %s2444_s29  ;;  %490 = vrot.lane.b32.xlu0 %v287_v3, %s2444_s29 }
  0x23   : > { %298 = vrot.lane.b32.xlu1 %v489_v5, %s2442_s27  ;;  %314 = vrot.lane.b32.xlu0 %v489_v5, %s2443_s28 }
  0x27   : > { %594 = vrot.lane.b32.xlu1 %v489_v5, %s2445_s30  ;;  %492 = vrot.lane.b32.xlu0 %v489_v5, %s2444_s29 }
  0x2b   : > { %592 = vrot.lane.b32.xlu1 %v287_v3, %s2445_s30  ;;  %596 = vrot.lane.b32.xlu0 %v588_v6, %s2445_s30  ;;  %v2242_v6 = vld [vmem:[%s2873_s1 + $0x30] sm:$0xff] }
  0x2f   : > { %783 = vrot.lane.b32.xlu1 %v775_v8, %s2446_s7  ;;  %781 = vrot.lane.b32.xlu0 %v2519_v7, %s2446_s7 }
  0x33   : > { %883 = vrot.lane.b32.xlu1 %v2519_v7, %s2447_s8  ;;  %779 = vrot.lane.b32.xlu0 %v2511_v1, %s2446_s7 }
  0x37   : > { %881 = vrot.lane.b32.xlu1 %v2511_v1, %s2447_s8  ;;  %885 = vrot.lane.b32.xlu0 %v877_v9, %s2447_s8 }
  0x3b   : > { %989 = vrot.lane.b32.xlu1 %v979_v10, %s2448_s9  ;;  %987 = vrot.lane.b32.xlu0 %v2519_v7, %s2448_s9 }
  0x3f   : > { %1081 = vrot.lane.b32.xlu1 %v2519_v7, %s2450_s10  ;;  %985 = vrot.lane.b32.xlu0 %v2511_v1, %s2448_s9 }
  0x43   : > { %1079 = vrot.lane.b32.xlu1 %v2511_v1, %s2450_s10  ;;  %1083 = vrot.lane.b32.xlu0 %v1075_v12, %s2450_s10  ;;  %v2246_v12 = vld [vmem:[%s2873_s1 + $0x38] sm:$0xff] }
  0x47   : > { %1179 = vperm.xlu0 %2429, %v1176_v13   ;;  %v1221_v13 = vld [vmem:[%s2875_s3 + $0xf8] sm:$0xff]  ;;  %1330 = vrot.lane.b32.xlu1 %v2441_v0, %s2453_s17 }
  0x4b   : > { %1317 = vrot.lane.b32.xlu0 %v2441_v0, %s2451_s15 }
  0x4f   : > { %1501 = vrot.lane.b32.xlu0 %v2441_v0, %s2452_s16 }
  0x53   : > { %1595 = vrot.lane.b32.xlu0 %v2441_v0, %s2445_s30 }
  0x89   : > { %v301_v16 = vpop.permute.xlu1 %300  ;;  %v317_v17 = vpop.permute.xlu0 %316 }
  0x8d   : > { %v297_v19 = vpop.permute.xlu1 %296  ;;  %v313_v20 = vpop.permute.xlu0 %312 }
  0x91   : > { %v495_v23 = vpop.permute.xlu1 %494  ;;  %v491_v24 = vpop.permute.xlu0 %490 }
  0x95   : > { %v299_v27 = vpop.permute.xlu1 %298  ;;  %v315_v28 = vpop.permute.xlu0 %314 }
  0x96   : > { %v303_v29 = vsel %vm302_vm0, %v297_v19, %v299_v27  ;;  %v320_v30 = vsel %vm318_vm1, %v315_v28, %v317_v17  ;;  %v319_v31 = vsel %vm318_vm1, %v313_v20, %v315_v28  ;;  %v304_v32 = vsel %vm302_vm0, %v299_v27, %v301_v16  ;;  %v1203_v27 = vld [vmem:[%s2875_s3 + $0x68] sm:$0xff]  ;;  %v1218_v28 = vld [vmem:[%s2875_s3 + $0xe0] sm:$0xff] }
  0x97   : > { %2220 = vmatprep.subr.msk.mxu0 %vm325_vm2, %v320_v30  ;;  %v308_v34 = vsel %vm2539_vm3, %v304_v32, 0.0  ;;  %v307_v35 = vsel %vm2543_vm4, %v303_v29, 0.0  ;;  %v1202_v29 = vld [vmem:[%s2875_s3 + $0x60] sm:$0xff]  ;;  %v1217_v30 = vld [vmem:[%s2875_s3 + $0xd8] sm:$0xff]  ;;  %v1216_v32 = vld [vmem:[%s2875_s3 + $0xd0] sm:$0xff]  ;;  %vm1294_vm0 = vcmask 523264  }
  0x98   : > { %2221 = vmatpush1.msk.msra.mxu0 %vm325_vm2, %v319_v31  ;;  %2223 = vmatprep.subr.msk.mxu1 %vm325_vm2, %v308_v34  ;;  %v1201_v31 = vld [vmem:[%s2875_s3 + $0x58] sm:$0xff]  ;;  %v1215_v34 = vld [vmem:[%s2875_s3 + $0xc8] sm:$0xff]  ;;  %vm1334_vm1 = vcmask 64512  }
  0x99   : > { %2224 = vmatpush1.msk.msra.mxu1 %vm325_vm2, %v307_v35  ;;  %v595_v39 = vpop.permute.xlu1 %594  ;;  %v493_v40 = vpop.permute.xlu0 %492  ;;  %2222 = vmatmul.mubr.msk.f32.vlgmr.msra.gmra.mxu0 %vm321_vm5, %v2219_v33  ;;  %v1200_v33 = vld [vmem:[%s2875_s3 + $0x50] sm:$0xff]  ;;  %v1199_v35 = vld [vmem:[%s2875_s3 + $0x48] sm:$0xff] }
  0x9a   : > { %v497_v41 = vsel %vm496_vm6, %v491_v24, %v493_v40  ;;  %v498_v42 = vsel %vm496_vm6, %v493_v40, %v495_v23  ;;  %2225 = vmatmul.mubr.msk.f32.vlgmr.msra.gmra.mxu1 %vm321_vm5, %v309_v36  ;;  %578 = vmatprep.mubr.f32.mxu0 %v2441_v0  ;;  %v1205_v23 = vld [vmem:[%s2875_s3 + $0x78] sm:$0xff]  ;;  %v1220_v24 = vld [vmem:[%s2875_s3 + $0xf0] sm:$0xff]  ;;  %v1214_v36 = vld [vmem:[%s2875_s3 + $0xc0] sm:$0xff] }
  0x9b   : > { %v501_v43 = vsel %vm2560_vm7, %v497_v41, 0.0  ;;  %v502_v44 = vsel %vm2564_vm8, %v498_v42, 0.0  ;;  %680 = vmatprep.mubr.f32.mxu1 %v2441_v0  ;;  %v1212_v40 = vld [vmem:[%s2875_s3 + $0xb0] sm:$0xff]  ;;  %v1211_v42 = vld [vmem:[%s2875_s3 + $0xa8] sm:$0xff] }
  0x9c   : > { %2227 = vmatprep.subr.msk.mxu0 %vm325_vm2, %v502_v44  ;;  %v1196_v41 = vld [vmem:[%s2875_s3 + $0x30] sm:$0xff]  ;;  %v1210_v44 = vld [vmem:[%s2875_s3 + $0xa0] sm:$0xff] }
  0x9d   : > { %v593_v46 = vpop.permute.xlu1 %592  ;;  %2228 = vmatpush1.msk.msra.mxu0 %vm325_vm2, %v501_v43  ;;  %v597_v47 = vpop.permute.xlu0 %596  ;;  %v1195_v43 = vld [vmem:[%s2875_s3 + $0x28] sm:$0xff] }
  0x9e   : > { %v599_v48 = vsel %vm598_vm9, %v593_v46, %v595_v39  ;;  %v600_v49 = vsel %vm598_vm9, %v595_v39, %v597_v47  ;;  %2229 = vmatmul.mubr.msk.f32.vlgmr.msra.gmra.mxu0 %vm321_vm5, %v2226_v45  ;;  %2235 = vmatprep.subr.msk.mxu0 %vm325_vm2, %v2519_v7  ;;  %v1197_v39 = vld [vmem:[%s2875_s3 + $0x38] sm:$0xff]  ;;  %v1194_v45 = vld [vmem:[%s2875_s3 + $0x20] sm:$0xff] }
  0x9f   : > { %v603_v50 = vsel %vm2543_vm4, %v599_v48, 0.0  ;;  %v604_v51 = vsel %vm2539_vm3, %v600_v49, 0.0  ;;  %2236 = vmatpush1.msk.msra.mxu0 %vm325_vm2, %v2511_v1  ;;  %765 = vmatprep.mubr.f32.mxu0 %v2441_v0  ;;  %v1209_v46 = vld [vmem:[%s2875_s3 + $0x98] sm:$0xff]  ;;  %v1208_v48 = vld [vmem:[%s2875_s3 + $0x90] sm:$0xff] }
  0xa0   : > { %2231 = vmatprep.subr.msk.mxu1 %vm325_vm2, %v604_v51  ;;  %v1193_v47 = vld [vmem:[%s2875_s3 + $0x18] sm:$0xff]  ;;  %v1192_v49 = vld [vmem:[%s2875_s3 + $0x10] sm:$0xff]  ;;  %v1191_v51 = vld [vmem:[%s2875_s3 + $0x8] sm:$0xff] }
  0xa1   : > { %v784_v54 = vpop.permute.xlu1 %783  ;;  %2232 = vmatpush1.msk.msra.mxu1 %vm325_vm2, %v603_v50  ;;  %v782_v55 = vpop.permute.xlu0 %781  ;;  %v1207_v50 = vld [vmem:[%s2875_s3 + $0x88] sm:$0xff] }
  0xa2   : > { %v787_v56 = vsel %vm785_vm10, %v782_v55, %v784_v54  ;;  %2233 = vmatmul.mubr.msk.f32.vlgmr.msra.gmra.mxu1 %vm321_vm5, %v2230_v52  ;;  %2237 = vmatmul.mubr.msk.f32.vlgmr.msra.gmra.mxu0 %vm321_vm5, %v2234_v53  ;;  %v1206_v52 = vld [vmem:[%s2875_s3 + $0x80] sm:$0xff] }
  0xa3   : > { %v791_v57 = vsel %vm2564_vm8, %v787_v56, 0.0  ;;  %867 = vmatprep.mubr.f32.mxu1 %v2441_v0  ;;  %969 = vmatprep.mubr.f32.mxu0 %v2441_v0  ;;  %v1190_v53 = vld [vmem:[%s2875_s3] sm:$0xff] }
  0xa4   : > { %2239 = vmatprep.subr.msk.mxu1 %vm325_vm2, %v791_v57 }
  0xa5   : > { %v884_v58 = vpop.permute.xlu1 %883  ;;  %v780_v59 = vpop.permute.xlu0 %779 }
  0xa6   : > { %v786_v60 = vsel %vm785_vm10, %v780_v59, %v782_v55 }
  0xa7   : > { %v790_v62 = vsel %vm2560_vm7, %v786_v60, 0.0 }
  0xa8   : > { %2240 = vmatpush1.msk.msra.mxu1 %vm325_vm2, %v790_v62 }
  0xa9   : > { %v882_v63 = vpop.permute.xlu1 %881  ;;  %v886_v1 = vpop.permute.xlu0 %885  ;;  %2241 = vmatmul.mubr.msk.f32.vlgmr.msra.gmra.mxu1 %vm321_vm5, %v2238_v61 }
  0xaa   : > { %v888_v2 = vsel %vm887_vm11, %v882_v63, %v884_v58  ;;  %v889_v3 = vsel %vm887_vm11, %v884_v58, %v886_v1  ;;  %1065 = vmatprep.mubr.f32.mxu1 %v2441_v0 }
  0xab   : > { %v892_v4 = vsel %vm2543_vm4, %v888_v2, 0.0  ;;  %v893_v5 = vsel %vm2539_vm3, %v889_v3, 0.0  ;;  %vm1505_vm4 = vcmask 56320  }
  0xac   : > { %2243 = vmatprep.subr.msk.mxu0 %vm325_vm2, %v893_v5 }
  0xad   : > { %v990_v7 = vpop.permute.xlu1 %989  ;;  %2244 = vmatpush1.msk.msra.mxu0 %vm325_vm2, %v892_v4  ;;  %v988_v8 = vpop.permute.xlu0 %987 }
  0xae   : > { %v993_v9 = vsel %vm991_vm12, %v988_v8, %v990_v7  ;;  %2245 = vmatmul.mubr.msk.f32.vlgmr.msra.gmra.mxu0 %vm321_vm5, %v2242_v6 }
  0xaf   : > { %2247 = vmatprep.subr.msk.mxu1 %vm325_vm2, %v993_v9  ;;  %1167 = vmatprep.mubr.f32.mxu0 %v2441_v0  ;;  %v2133_v0 = vld [vmem:[%s2877_s5] sm:$0xff] }
  0xb1   : > { %v1082_v10 = vpop.permute.xlu1 %1081  ;;  %v986_v11 = vpop.permute.xlu0 %985 }
  0xb2   : > { %v992_v14 = vsel %vm991_vm12, %v986_v11, %v988_v8 }
  0xb3   : > { %2248 = vmatpush1.msk.msra.mxu1 %vm325_vm2, %v992_v14 }
  0xb4   : > { %2249 = vmatmul.mubr.msk.f32.vlgmr.msra.gmra.mxu1 %vm321_vm5, %v2246_v12  ;;  %2298 = vmatprep.subr.mxu1 %v1221_v13 }
  0xb5   : > { %v1080_v16 = vpop.permute.xlu1 %1079  ;;  %v1084_v17 = vpop.permute.xlu0 %1083  ;;  %2299 = vmatpush3.msra.mxu1 %v1205_v23 }
  0xb6   : > { %v1086_v18 = vsel %vm1085_vm13, %v1080_v16, %v1082_v10  ;;  %v1087_v19 = vsel %vm1085_vm13, %v1082_v10, %v1084_v17  ;;  %2300 = vmatprep.subr.mxu1 %v1220_v24 }
  0xb7   : > { %v1090_v20 = vsel %vm2560_vm7, %v1086_v18, 0.0  ;;  %v1091_v21 = vsel %vm2564_vm8, %v1087_v19, 0.0  ;;  %2301 = vmatpush3.msra.mxu1 %v1204_v25 }
  0xb8   : > { %2251 = vmatprep.subr.msk.mxu0 %vm325_vm2, %v1091_v21  ;;  %2302 = vmatprep.subr.mxu1 %v1219_v26 }
  0xb9   : > { %2252 = vmatpush1.msk.msra.mxu0 %vm325_vm2, %v1090_v20  ;;  %2303 = vmatpush3.msra.mxu1 %v1203_v27  ;;  %vm1321_vm2 = vcmask 72704  }
  0xba   : > { %2253 = vmatmul.mubr.msk.f32.vlgmr.msra.gmra.mxu0 %vm321_vm5, %v2250_v22  ;;  %2304 = vmatprep.subr.mxu1 %v1218_v28 }
  0xbb   : > { %2305 = vmatpush3.msra.mxu1 %v1202_v29 }
  0xbc   : > { %2306 = vmatprep.subr.mxu1 %v1217_v30 }
  0xbd   : > { %2307 = vmatpush3.msra.mxu1 %v1201_v31 }
  0xbe   : > { %2308 = vmatprep.subr.mxu1 %v1216_v32 }
  0xbf   : > { %2309 = vmatpush3.msra.mxu1 %v1200_v33 }
  0xc0   : > { %2310 = vmatprep.subr.mxu1 %v1215_v34  ;;  %v2254_v34 = vld [vmem:[%s2876_s4 + $0x10] sm:$0xff] }
  0xc1   : > { %2311 = vmatpush3.msra.mxu1 %v1199_v35  ;;  %2362 = vmatprep.mubr.msk.f32.mxu0 %vm1334_vm1, %v2254_v34 }
  0xc2   : > { %2312 = vmatprep.subr.mxu1 %v1214_v36  ;;  %v1180_v22 = vpop.permute.xlu0 %1179 }
  0xc3   : > { %2313 = vmatpush3.msra.mxu1 %v1198_v37 }
  0xc4   : > { %2314 = vmatprep.subr.mxu1 %v1213_v38  ;;  %v2289_v38 = vld [vmem:[%s2876_s4 + $0x80] sm:$0xff] }
  0xc5   : > { %2315 = vmatpush3.msra.mxu1 %v1197_v39  ;;  %v2134_v39 = vld [vmem:[%s2877_s5 + $0x8] sm:$0xff] }
  0xc6   : > { %2316 = vmatprep.subr.mxu1 %v1212_v40  ;;  %v1331_v40 = vpop.permute.xlu1 %1330 }
  0xc7   : > { %2317 = vmatpush3.msra.mxu1 %v1196_v41  ;;  %v1318_v41 = vpop.permute.xlu0 %1317 }
  0xc8   : > { %2318 = vmatprep.subr.mxu1 %v1211_v42  ;;  %v1301_v42 = vand.u32 7, %v2535_v15 }
  0xc9   : > { %2319 = vmatpush3.msra.mxu1 %v1195_v43 }
  0xca   : > { %2320 = vmatprep.subr.mxu1 %v1210_v44  ;;  %vm2772_vm3 = vcmp.ne.s32.totalorder %v1301_v42, 0  ;;  %vm2788_vm5 = vcmp.ne.s32.totalorder %v1301_v42, 7 }
  0xcb   : > { %2321 = vmatpush3.msra.mxu1 %v1194_v45  ;;  %v2255_v45 = vld [vmem:[%s2876_s4 + $0x18] sm:$0xff] }
  0xcc   : > { %2322 = vmatprep.subr.mxu1 %v1209_v46  ;;  %v1325_v46 = vld [vmem:[%s2876_s4] sm:$0xff] }
  0xcd   : > { %2323 = vmatpush3.msra.mxu1 %v1193_v47 }
  0xce   : > { %2324 = vmatprep.subr.mxu1 %v1208_v48  ;;  %v1502_v48 = vpop.permute.xlu0 %1501 }
  0xcf   : > { %2325 = vmatpush3.msra.mxu1 %v1192_v49 }
  0xd0   : > { %2326 = vmatprep.subr.mxu1 %v1207_v50  ;;  %v1326_v50 = vld [vmem:[%s2876_s4 + $0x8] sm:$0xff] }
  0xd1   : > { %2327 = vmatpush3.msra.mxu1 %v1191_v51  ;;  %v2261_v51 = vld [vmem:[%s2876_s4 + $0x20] sm:$0xff] }
  0xd2   : > { %2328 = vmatprep.subr.mxu1 %v1206_v52 }
  0xd3   : > { %2329 = vmatpush3.msra.mxu1 %v1190_v53 }
 0x159   : > { %v396_v54 = vpop.f32.mrf.mxu0 }
 0x15a   : > { %v476_v56 = vpop.f32.mrf.mxu1 }
 0x15b   : > { %v398_v55 = vpop.f32.mrf.mxu0  ;;  %v477_v59 = vadd.f32 %v476_v56, %v396_v54  ;;  %v2266_v56 = vld [vmem:[%s2876_s4 + $0x30] sm:$0xff] }
 0x15c   : > { %v478_v57 = vpop.f32.mrf.mxu1 }
 0x15d   : > { %v479_v60 = vadd.f32 %v478_v57, %v398_v55  ;;  %v2262_v55 = vld [vmem:[%s2876_s4 + $0x28] sm:$0xff]  ;;  %v1596_v57 = vpop.permute.xlu0 %1595 }
 0x15e   : > { %v580_v58 = vpop.f32.mrf.mxu0 }
 0x15f   : > { %v585_v63 = vadd.f32 %v580_v58, %v477_v59 }
 0x160   : > { %v582_v61 = vpop.f32.mrf.mxu0 }
 0x161   : > { %v586_v1 = vadd.f32 %v582_v61, %v479_v60  ;;  %v2267_v60 = vld [vmem:[%s2876_s4 + $0x38] sm:$0xff]  ;;  %v2271_v61 = vld [vmem:[%s2876_s4 + $0x40] sm:$0xff] }
 0x162   : > { %v682_v62 = vpop.f32.mrf.mxu1  ;;  %v767_v3 = vpop.f32.mrf.mxu0 }
 0x163   : > { %v687_v4 = vadd.f32 %v682_v62, %v585_v63 }
 0x164   : > { %v684_v2 = vpop.f32.mrf.mxu1  ;;  %v769_v6 = vpop.f32.mrf.mxu0 }
 0x165   : > { %v688_v5 = vadd.f32 %v684_v2, %v586_v1  ;;  %v772_v8 = vadd.f32 %v767_v3, %v687_v4  ;;  %v2272_v1 = vld [vmem:[%s2876_s4 + $0x48] sm:$0xff]  ;;  %v2275_v3 = vld [vmem:[%s2876_s4 + $0x50] sm:$0xff] }
 0x166   : > { %v2290_v4 = vld [vmem:[%s2876_s4 + $0x88] sm:$0xff] }
 0x167   : > { %v773_v9 = vadd.f32 %v769_v6, %v688_v5  ;;  %v2276_v5 = vld [vmem:[%s2876_s4 + $0x58] sm:$0xff]  ;;  %v2280_v6 = vld [vmem:[%s2876_s4 + $0x60] sm:$0xff] }
 0x169   : > { %v869_v7 = vpop.f32.mrf.mxu1 }
 0x16a   : > { %v874_v12 = vadd.f32 %v869_v7, %v772_v8  ;;  %v2281_v8 = vld [vmem:[%s2876_s4 + $0x68] sm:$0xff] }
 0x16b   : > { %v871_v10 = vpop.f32.mrf.mxu1 }
 0x16c   : > { %v875_v13 = vadd.f32 %v871_v10, %v773_v9  ;;  %v2285_v9 = vld [vmem:[%s2876_s4 + $0x70] sm:$0xff]  ;;  %v2286_v10 = vld [vmem:[%s2876_s4 + $0x78] sm:$0xff] }
 0x16e   : > { %v971_v11 = vpop.f32.mrf.mxu0 }
 0x16f   : > { %v976_v17 = vadd.f32 %v971_v11, %v874_v12 }
 0x170   : > { %v973_v14 = vpop.f32.mrf.mxu0 }
 0x171   : > { %v977_v18 = vadd.f32 %v973_v14, %v875_v13 }
 0x174   : > { %v1067_v16 = vpop.f32.mrf.mxu1 }
 0x175   : > { %v1072_v20 = vadd.f32 %v1067_v16, %v976_v17 }
 0x176   : > { %v1069_v19 = vpop.f32.mrf.mxu1 }
 0x177   : > { %v1073_v23 = vadd.f32 %v1069_v19, %v977_v18 }
 0x17a   : > { %v1169_v21 = vpop.f32.mrf.mxu0 }
 0x17b   : > { %v1174_v24 = vadd.f32 %v1169_v21, %v1072_v20 }
 0x17c   : > { %v1171_v25 = vpop.f32.mrf.mxu0 }
 0x17d   : > { %v1175_v26 = vadd.f32 %v1171_v25, %v1073_v23  ;;  %v1182_v27 = vadd.f32 %v1180_v22, %v1174_v24 }
 0x17f   : > { %v1183_v28 = vadd.f32 %v1180_v22, %v1175_v26  ;;  %v1186_v29 = vmul.f32 0.01, %v1182_v27  ;;  %vm1184_vm15 = vcmp.ge.f32.partialorder %v1182_v27, 0.0 }
 0x181   : > { %vm1185_vm14 = vcmp.ge.f32.partialorder %v1183_v28, 0.0  ;;  %v1187_v30 = vmul.f32 0.01, %v1183_v28  ;;  %v1188_v32 = vsel %vm1184_vm15, %v1182_v27, %v1186_v29 }
 0x183   : > { %v1189_v31 = vsel %vm1185_vm14, %v1183_v28, %v1187_v30 }
 0x184   : > { %1286 = vmatprep.mubr.f32.mxu1 %v1189_v31 }
 0x185   : > { %1287 = vmatmul.mubr.f32.vlgmr.msra.gmra.mxu1 %v1188_v32 }
 0x186   : > { %2402 = vmatprep.mubr.msk.f32.mxu1 %vm1334_vm1, %v2289_v38 }
 0x245   : > { %v2330_v33 = vpop.f32.mrf.mxu1 }
 0x247   : > { %v2331_v35 = vpop.f32.mrf.mxu1 }
 0x248   : > { %v2332_v36 = vadd.f32 %v2331_v35, %v2330_v33 }
 0x24a   : > { %1296 = vst.msk [vmem:[#allocation3 + $0x8] sm:$0xff] %vm1294_vm0, %v2332_v36 }
 0x251   : > { %v1312_v37 = vld [vmem:[#allocation3 + $0x8] sm:$0xff] }
 0x252   : > { %1774 = vrot.lane.b32.xlu0 %v1312_v37, %s2446_s7  ;;  %1332 = vrot.lane.b32.xlu1 %v1312_v37, %s2453_s17  ;;  %s2456_s7 = smov 119   ;;  %s2297_s17 = sshll.u32 %s2892_s22, 4 }
 0x256   : > { %1957 = vrot.lane.b32.xlu0 %v1312_v37, %s2454_s20  ;;  %1319 = vrot.lane.b32.xlu1 %v1312_v37, %s2451_s15  ;;  %s251_s20 = scalar_lea.vmem %s2878_s6, %s2297_s17 }
 0x25a   : > { %2137 = vperm.xlu0 %2429, %v2133_v0   ;;  %1503 = vrot.lane.b32.xlu1 %v1312_v37, %s2452_s16 }
 0x25e   : > { %1597 = vrot.lane.b32.xlu1 %v1312_v37, %s2445_s30 }
 0x262   : > { %1864 = vrot.lane.b32.xlu1 %v1312_v37, %s2455_s25 }
 0x266   : > { %2043 = vrot.lane.b32.xlu1 %v1312_v37, %s2456_s7 }
 0x26a   : > { %2142 = vperm.xlu1 %2430, %v2134_v39  }
 0x2c4   : > { %v1333_v43 = vpop.permute.xlu1 %1332  ;;  %v1775_v63 = vpop.permute.xlu0 %1774 }
 0x2c5   : > { %v1335_v44 = vsel %vm1334_vm1, %v1331_v40, %v1333_v43 }
 0x2c6   : > { %2360 = vmatprep.subr.mxu0 %v1335_v44 }
 0x2c7   : > { %2361 = vmatpush3.msra.mxu0 %v1335_v44 }
 0x2c8   : > { %2363 = vmatmul.mubr.msk.f32.vlgmr.msra.gmra.mxu0 %vm1334_vm1, %v2255_v45  ;;  %v1320_v15 = vpop.permute.xlu1 %1319  ;;  %v1958_v7 = vpop.permute.xlu0 %1957 }
 0x2c9   : > { %v1322_v49 = vsel %vm1321_vm2, %v1318_v41, %v1320_v15  ;;  %2367 = vmatprep.mubr.msk.f32.mxu0 %vm1334_vm1, %v1325_v46 }
 0x2ca   : > { %2365 = vmatprep.subr.msk.mxu0 %vm2772_vm3, %v1322_v49 }
 0x2cb   : > { %2366 = vmatpush3.msk.msra.mxu0 %vm2772_vm3, %v1322_v49 }
 0x2cc   : > { %v1504_v53 = vpop.permute.xlu1 %1503  ;;  %2368 = vmatmul.mubr.msk.f32.vlgmr.msra.gmra.mxu0 %vm1334_vm1, %v1326_v50 }
 0x2cd   : > { %v1506_v54 = vsel %vm1505_vm4, %v1502_v48, %v1504_v53  ;;  %2372 = vmatprep.mubr.msk.f32.mxu0 %vm1334_vm1, %v2261_v51 }
 0x2ce   : > { %2370 = vmatprep.subr.msk.mxu0 %vm2788_vm5, %v1506_v54 }
 0x2cf   : > { %2371 = vmatpush3.msk.msra.mxu0 %vm2788_vm5, %v1506_v54 }
 0x2d0   : > { %v1598_v58 = vpop.permute.xlu1 %1597  ;;  %2373 = vmatmul.mubr.msk.f32.vlgmr.msra.gmra.mxu0 %vm1334_vm1, %v2262_v55 }
 0x2d1   : > { %v1599_v59 = vsel %vm598_vm9, %v1596_v57, %v1598_v58  ;;  %2377 = vmatprep.mubr.msk.f32.mxu0 %vm1334_vm1, %v2266_v56 }
 0x2d2   : > { %2375 = vmatprep.subr.msk.mxu0 %vm2772_vm3, %v1599_v59 }
 0x2d3   : > { %2376 = vmatpush3.msk.msra.mxu0 %vm2772_vm3, %v1599_v59 }
 0x2d4   : > { %v1865_v62 = vpop.permute.xlu1 %1864  ;;  %2378 = vmatmul.mubr.msk.f32.vlgmr.msra.gmra.mxu0 %vm1334_vm1, %v2267_v60  ;;  %2380 = vmatprep.subr.mxu0 %v1312_v37 }
 0x2d5   : > { %2381 = vmatpush3.msra.mxu0 %v1312_v37  ;;  %2382 = vmatprep.mubr.msk.f32.mxu0 %vm1334_vm1, %v2271_v61  ;;  %v2138_v47 = vpop.permute.xlu0 %2137 }
 0x2d6   : > { %2385 = vmatprep.subr.msk.mxu0 %vm2788_vm5, %v1775_v63 }
 0x2d8   : > { %v2044_v2 = vpop.permute.xlu1 %2043  ;;  %2383 = vmatmul.mubr.msk.f32.vlgmr.msra.gmra.mxu0 %vm1334_vm1, %v2272_v1 }
 0x2d9   : > { %2386 = vmatpush3.msk.msra.mxu0 %vm2788_vm5, %v1775_v63  ;;  %2400 = vmatprep.subr.msk.mxu1 %vm2788_vm5, %v2044_v2 }
 0x2da   : > { %2390 = vmatprep.subr.msk.mxu0 %vm2772_vm3, %v1865_v62  ;;  %2401 = vmatpush3.msk.msra.mxu1 %vm2788_vm5, %v2044_v2 }
 0x2db   : > { %2387 = vmatprep.mubr.msk.f32.mxu0 %vm1334_vm1, %v2275_v3  ;;  %2403 = vmatmul.mubr.msk.f32.vlgmr.msra.gmra.mxu1 %vm1334_vm1, %v2290_v4 }
 0x2dc   : > { %2388 = vmatmul.mubr.msk.f32.vlgmr.msra.gmra.mxu0 %vm1334_vm1, %v2276_v5 }
 0x2dd   : > { %2391 = vmatpush3.msk.msra.mxu0 %vm2772_vm3, %v1865_v62  ;;  %2392 = vmatprep.mubr.msk.f32.mxu0 %vm1334_vm1, %v2280_v6 }
 0x2de   : > { %2395 = vmatprep.subr.mxu0 %v1958_v7 }
 0x2e0   : > { %2393 = vmatmul.mubr.msk.f32.vlgmr.msra.gmra.mxu0 %vm1334_vm1, %v2281_v8 }
 0x2e1   : > { %2396 = vmatpush3.msra.mxu0 %v1958_v7  ;;  %2397 = vmatprep.mubr.msk.f32.mxu0 %vm1334_vm1, %v2285_v9 }
 0x2e4   : > { %2398 = vmatmul.mubr.msk.f32.vlgmr.msra.gmra.mxu0 %vm1334_vm1, %v2286_v10 }
 0x2e5   : > { %v2143_v41 = vpop.permute.xlu1 %2142 }
 0x388   : > { %v2364_v11 = vpop.f32.mrf.mxu0 }
 0x38a   : > { %v1409_v12 = vpop.f32.mrf.mxu0 }
 0x38c   : > { %v2369_v13 = vpop.f32.mrf.mxu0 }
 0x38d   : > { %v1496_v21 = vadd.f32 %v2369_v13, %v2364_v11 }
 0x38e   : > { %v1490_v14 = vpop.f32.mrf.mxu0 }
 0x38f   : > { %v1491_v23 = vadd.f32 %v1490_v14, %v1409_v12 }
 0x390   : > { %v2374_v16 = vpop.f32.mrf.mxu0 }
 0x391   : > { %v1594_v24 = vadd.f32 %v2374_v16, %v1496_v21 }
 0x392   : > { %v1584_v17 = vpop.f32.mrf.mxu0 }
 0x393   : > { %v1593_v26 = vadd.f32 %v1584_v17, %v1491_v23 }
 0x394   : > { %v2379_v18 = vpop.f32.mrf.mxu0 }
 0x395   : > { %v1687_v27 = vadd.f32 %v2379_v18, %v1594_v24 }
 0x396   : > { %v1677_v19 = vpop.f32.mrf.mxu0 }
 0x397   : > { %v1686_v29 = vadd.f32 %v1677_v19, %v1593_v26 }
 0x398   : > { %v2384_v20 = vpop.f32.mrf.mxu0 }
 0x399   : > { %v1773_v30 = vadd.f32 %v2384_v20, %v1687_v27 }
 0x39a   : > { %v1763_v22 = vpop.f32.mrf.mxu0 }
 0x39b   : > { %v1772_v32 = vadd.f32 %v1763_v22, %v1686_v29  ;;  %v2404_v0 = vpop.f32.mrf.mxu1 }
 0x39c   : > { %v2389_v25 = vpop.f32.mrf.mxu0 }
 0x39d   : > { %v1863_v33 = vadd.f32 %v2389_v25, %v1773_v30  ;;  %v2122_v44 = vpop.f32.mrf.mxu1 }
 0x39e   : > { %v1853_v28 = vpop.f32.mrf.mxu0 }
 0x39f   : > { %v1862_v35 = vadd.f32 %v1853_v28, %v1772_v32 }
 0x3a0   : > { %v2394_v31 = vpop.f32.mrf.mxu0 }
 0x3a1   : > { %v1953_v36 = vadd.f32 %v2394_v31, %v1863_v33 }
 0x3a2   : > { %v1943_v34 = vpop.f32.mrf.mxu0 }
 0x3a3   : > { %v1952_v38 = vadd.f32 %v1943_v34, %v1862_v35 }
 0x3a4   : > { %v2399_v37 = vpop.f32.mrf.mxu0 }
 0x3a5   : > { %v2042_v39 = vadd.f32 %v2399_v37, %v1953_v36 }
 0x3a6   : > { %v2032_v40 = vpop.f32.mrf.mxu0 }
 0x3a7   : > { %v2041_v42 = vadd.f32 %v2032_v40, %v1952_v38  ;;  %v2132_v43 = vadd.f32 %v2404_v0, %v2042_v39 }
 0x3a9   : > { %v2131_v45 = vadd.f32 %v2122_v44, %v2041_v42  ;;  %v2146_v46 = vadd.f32 %v2143_v41, %v2132_v43 }
 0x3ab   : > { %v2145_v15 = vadd.f32 %v2138_v47, %v2131_v45  ;;  %vm2148_vm6 = vcmp.ge.f32.partialorder %v2146_v46, 0.0  ;;  %v2150_v48 = vmul.f32 0.01, %v2146_v46 }
 0x3ad   : > { %vm2147_vm7 = vcmp.ge.f32.partialorder %v2145_v15, 0.0  ;;  %v2149_v49 = vmul.f32 0.01, %v2145_v15  ;;  %v2152_v50 = vsel %vm2148_vm6, %v2146_v46, %v2150_v48 }
 0x3ae   : > { %2154 = vst.msk [vmem:[%s251_s20 + $0x8] sm:$0xff] %vm1294_vm0, %v2152_v50 }
 0x3af   : > { %v2151_v51 = vsel %vm2147_vm7, %v2145_v15, %v2149_v49 }
 0x3b0   : > { %2153 = vst.msk [vmem:[%s251_s20] sm:$0xff] %vm1294_vm0, %v2151_v51 }
 0x3b1 PF: > { %s16_s21 = sadd.s32 1, %s2439_s21  }
 0x3b2   : > { %p13_p4 = scmp.ge.s32.totalorder %s16_s21, 4  }
 0x3b4   :  { %15 = sbr.rel (!%p13_p4) target bundleno = 1 (0x1), region = 90 }

</bundles_post_ra>
